<compile_context>
chip_gen: v5e
topology: v5e:2x2
jax: 0.10.0
libtpu: 0.0.40
codegen_flags: <defaults>
</compile_context>

<pallas_src>
import jax
import jax.numpy as jnp
from jax.experimental import pallas as pl
from jax.experimental.pallas import tpu as pltpu


def _merge_linear_kernel(x1_ref, x2_ref, w1_ref, w2_ref, b_ref, o_ref):
    # x1_ref: (n_blk, C1, t), x2_ref: (n_blk, C2, t)
    # w1_ref: (Cout, C1), w2_ref: (Cout, C2), b_ref: (Cout, 1) f32
    # o_ref:  (n_blk, Cout, t)
    w1 = w1_ref[...]
    w2 = w2_ref[...]
    b = b_ref[...]
    n_blk = o_ref.shape[0]
    for i in range(n_blk):                      # static unroll; n_blk is small
        acc = jnp.dot(w1, x1_ref[i], preferred_element_type=jnp.float32)
        acc = acc + jnp.dot(w2, x2_ref[i], preferred_element_type=jnp.float32)
        o_ref[i] = (acc + b).astype(o_ref.dtype)


def _vmem_capacity_bytes() -> int:
    """Physical VMEM per core; 128 MiB on v5e/v6e, 64 MiB per TC on v7x."""
    try:
        info = pltpu.get_tpu_info()
        cap = getattr(info, "vmem_capacity_bytes", None)
        if cap:
            return int(cap)
    except Exception:
        pass
    return 64 << 20  # conservative fallback (v7x per-TensorCore)


def _largest_divisor_le(n: int, cap: int) -> int:
    cap = max(1, min(n, cap))
    for d in range(cap, 0, -1):
        if n % d == 0:
            return d
    return 1


def merge_layer_linear(x1_nchw, x2_nchw, weight, bias, *,
                       compute_dtype=jnp.bfloat16, out_dtype=None,
                       max_tile_hw=None):
    """MergeLayer(merge_type='linear') forward.

    x1_nchw: (N, C1, H, W), x2_nchw: (N, C2, H, W)
    weight:  (Cout, C1+C2)  -- 1x1 conv kernel squeezed over its (1,1) spatial dims
    bias:    (Cout,)
    compute_dtype: dtype for activations/weights (default bf16 -> ~2x fewer HBM bytes;
                   pass jnp.float32 for exact semantics, or an fp8 dtype on v7x).
                   Accumulation is always f32 on the MXU; bias stays f32.
    out_dtype: output dtype; defaults to compute_dtype.
    max_tile_hw: optional cap on the spatial tile (mostly for tests); auto-sized
                 from VMEM capacity when None.
    returns: (N, Cout, H, W) in out_dtype.
    """
    N, C1, H, W = x1_nchw.shape
    N2, C2, H2, W2 = x2_nchw.shape
    assert (N, H, W) == (N2, H2, W2), "x1/x2 must share batch and spatial dims"
    Cout, Cin = weight.shape
    assert Cin == C1 + C2
    HW = H * W

    if compute_dtype is None:
        compute_dtype = x1_nchw.dtype
    if out_dtype is None:
        out_dtype = compute_dtype

    # Free reshapes (no data movement): NCHW -> (N, C, H*W).
    x1 = x1_nchw.reshape(N, C1, HW).astype(compute_dtype)
    x2 = x2_nchw.reshape(N, C2, HW).astype(compute_dtype)
    w1 = weight[:, :C1].astype(compute_dtype)            # (Cout, C1)
    w2 = weight[:, C1:].astype(compute_dtype)            # (Cout, C2)
    b = bias.reshape(Cout, 1).astype(jnp.float32)

    in_B = jnp.dtype(compute_dtype).itemsize
    out_B = jnp.dtype(out_dtype).itemsize

    # ---- Generation-aware tile sizing (biggest lever: mem-bound kernel). ----
    cap = _vmem_capacity_bytes()
    weight_bytes = 2 * (Cout * (C1 + C2) * in_B + Cout * 4)      # (double-buffered)
    budget = max(4 << 20, int(0.75 * cap) - weight_bytes - (2 << 20))

    # Per-spatial-lane bytes: double-buffered inputs + outputs + f32 acc temporaries.
    per_lane = 2 * (C1 + C2) * in_B + 2 * Cout * out_B + Cout * 4
    t_cap = max(1, budget // per_lane)
    if max_tile_hw is not None:
        t_cap = min(t_cap, int(max_tile_hw))

    if HW <= t_cap:
        t_hw = HW                                        # full extent: always legal
        # Small-HW regime: amortize the ~0.35us/step overhead by blocking batches.
        n_blk = _largest_divisor_le(N, max(1, t_cap // max(HW, 1)))
    else:
        t_hw = max(128, (min(HW, t_cap) // 128) * 128)   # lane-aligned partial tiles
        n_blk = 1

    # v7x has 2 TensorCores: keep >= 2 grid steps so the 'parallel' axes can shard.
    grid_n = pl.cdiv(N, n_blk)
    grid_hw = pl.cdiv(HW, t_hw)
    if grid_n * grid_hw < 2:
        if N >= 2:
            n_blk = _largest_divisor_le(N, N // 2)
        elif HW > 256 and t_hw == HW:
            half = pl.cdiv(HW, 2)
            t_hw = ((half + 127) // 128) * 128           # 2 tiles, tail masked
        grid_n = pl.cdiv(N, n_blk)
        grid_hw = pl.cdiv(HW, t_hw)

    # Explicit VMEM limit sized to actual usage (defaults are 16/32 MiB).
    tile_bytes = n_blk * t_hw * ((C1 + C2) * in_B + Cout * out_B)
    acc_bytes = n_blk * t_hw * Cout * 4
    usage = 2 * tile_bytes + weight_bytes + acc_bytes + (4 << 20)
    vmem_limit = int(min(cap, max(32 << 20, usage)))

    out_flat = pl.pallas_call(
        _merge_linear_kernel,
        out_shape=jax.ShapeDtypeStruct((N, Cout, HW), out_dtype),
        grid_spec=pltpu.PrefetchScalarGridSpec(
            num_scalar_prefetch=0,
            grid=(grid_n, grid_hw),
            in_specs=[
                pl.BlockSpec((n_blk, C1, t_hw), lambda n, i: (n, 0, i)),
                pl.BlockSpec((n_blk, C2, t_hw), lambda n, i: (n, 0, i)),
                pl.BlockSpec((Cout, C1), lambda n, i: (0, 0)),   # resident weights
                pl.BlockSpec((Cout, C2), lambda n, i: (0, 0)),
                pl.BlockSpec((Cout, 1), lambda n, i: (0, 0)),    # resident f32 bias
            ],
            out_specs=pl.BlockSpec((n_blk, Cout, t_hw), lambda n, i: (n, 0, i)),
        ),
        compiler_params=pltpu.CompilerParams(
            dimension_semantics=("parallel", "parallel"),  # megacore sharding on v7x
            vmem_limit_bytes=vmem_limit,
        ),
    )(x1, x2, w1, w2, b)

    # (N, Cout, H*W) -> (N, Cout, H, W): free reshape, no transpose.
    return out_flat.reshape(N, Cout, H, W)


def _reference(x1, x2, weight, bias):
    x_cat = jnp.concatenate([x1, x2], axis=1)                    # (N, C1+C2, H, W)
    return jnp.einsum("nchw,oc->nohw", x_cat, weight) + bias[None, :, None, None]


if __name__ == "__main__":
    # MergeLayer(channels=4, merge_type='linear') => Conv2d(8, 4, kernel_size=1, bias=True)
    N, C, Hs, Ws = 2, 4, 16, 16
    C1 = C2 = C
    Cout = C

    key = jax.random.PRNGKey(0)
    k1, k2, kw, kb = jax.random.split(key, 4)
    x1 = jax.random.normal(k1, (N, C1, Hs, Ws), dtype=jnp.float32)
    x2 = jax.random.normal(k2, (N, C2, Hs, Ws), dtype=jnp.float32)
    weight = jax.random.normal(kw, (Cout, C1 + C2), dtype=jnp.float32) * 0.1
    bias = jax.random.normal(kb, (Cout,), dtype=jnp.float32) * 0.1

    ref = _reference(x1, x2, weight, bias)

    # Exact f32 path (bit-level semantics of the PyTorch module).
    out_f32 = jax.block_until_ready(
        merge_layer_linear(x1, x2, weight, bias, compute_dtype=jnp.float32))
    assert out_f32.shape == (N, Cout, Hs, Ws) and out_f32.dtype == jnp.float32
    assert jnp.allclose(out_f32, ref, atol=1e-5, rtol=1e-5)

    # Default bf16 in/out path (mem-bound win); f32 MXU accumulation + f32 bias.
    out_bf16 = jax.block_until_ready(merge_layer_linear(x1, x2, weight, bias))
    assert out_bf16.dtype == jnp.bfloat16
    assert jnp.allclose(out_bf16.astype(jnp.float32), ref, atol=1e-1, rtol=1e-1)

    # Non-divisible spatial size with a forced small tile: exercises the cdiv grid
    # and the masked tail tile (tile rounding is handled inside the wrapper).
    x1_odd = jax.random.normal(k1, (N, C1, 17, 17), dtype=jnp.float32)
    x2_odd = jax.random.normal(k2, (N, C2, 17, 17), dtype=jnp.float32)
    ref_odd = _reference(x1_odd, x2_odd, weight, bias)
    out_odd = jax.block_until_ready(
        merge_layer_linear(x1_odd, x2_odd, weight, bias,
                           compute_dtype=jnp.float32, max_tile_hw=128))
    assert out_odd.shape == (N, Cout, 17, 17)
    assert jnp.allclose(out_odd, ref_odd, atol=1e-5, rtol=1e-5)

    # Small-HW / larger-N regime: exercises the in-kernel batch block (n_blk > 1).
    Nb = 8
    x1_b = jax.random.normal(k1, (Nb, C1, 8, 8), dtype=jnp.float32)
    x2_b = jax.random.normal(k2, (Nb, C2, 8, 8), dtype=jnp.float32)
    ref_b = _reference(x1_b, x2_b, weight, bias)
    out_b = jax.block_until_ready(
        merge_layer_linear(x1_b, x2_b, weight, bias, compute_dtype=jnp.float32))
    assert out_b.shape == (Nb, Cout, 8, 8)
    assert jnp.allclose(out_b, ref_b, atol=1e-5, rtol=1e-5)

    # TODO(synk): merge_type='residual'/'residual_ungated' wraps ResidualGatedBlock /
    # ResidualBlock (definitions not provided in the spec); only the 'linear' branch
    # is implemented.  On v7x, compute_dtype=jnp.float8_e4m3fn gives another ~2x
    # input-byte reduction (fp8 MXU); not enabled by default for portability.
    print("KERNEL_OK")
</pallas_src>

<mosaic_0001>
module attributes {stable_mosaic.version = 11 : i64} {
  func.func @_merge_linear_kernel(%arg0: i32, %arg1: i32, %arg2: memref<1x4x256xf32, #tpu.memory_space<vmem>>, %arg3: memref<1x4x256xf32, #tpu.memory_space<vmem>>, %arg4: memref<4x4xf32, #tpu.memory_space<vmem>>, %arg5: memref<4x4xf32, #tpu.memory_space<vmem>>, %arg6: memref<4x1xf32, #tpu.memory_space<vmem>>, %arg7: memref<1x4x256xf32, #tpu.memory_space<vmem>>) attributes {dimension_semantics = [#tpu.dimension_semantics<parallel>, #tpu.dimension_semantics<parallel>], iteration_bounds = array<i64: 2, 1>, scalar_prefetch = 0 : i64, scratch_operands = 0 : i64, tpu.core_type = #tpu.core_type<tc>, window_params = [{transform_indices = @transform_0, window_bounds = array<i64: 1, 4, 256>}, {transform_indices = @transform_1, window_bounds = array<i64: 1, 4, 256>}, {pipeline_mode = #tpu.pipeline_mode<synchronous>, transform_indices = @transform_2, window_bounds = array<i64: 4, 4>}, {pipeline_mode = #tpu.pipeline_mode<synchronous>, transform_indices = @transform_3, window_bounds = array<i64: 4, 4>}, {pipeline_mode = #tpu.pipeline_mode<synchronous>, transform_indices = @transform_4, window_bounds = array<i64: 4, 1>}, {transform_indices = @transform_5, window_bounds = array<i64: 1, 4, 256>}]} {
    %c0 = arith.constant 0 : index
    %c0_0 = arith.constant 0 : index
    %0 = vector.load %arg4[%c0, %c0_0] : memref<4x4xf32, #tpu.memory_space<vmem>>, vector<4x4xf32>
    %c0_1 = arith.constant 0 : index
    %c0_2 = arith.constant 0 : index
    %1 = vector.load %arg5[%c0_1, %c0_2] : memref<4x4xf32, #tpu.memory_space<vmem>>, vector<4x4xf32>
    %c0_3 = arith.constant 0 : index
    %c0_4 = arith.constant 0 : index
    %2 = vector.load %arg6[%c0_3, %c0_4] : memref<4x1xf32, #tpu.memory_space<vmem>>, vector<4x1xf32>
    %c0_5 = arith.constant 0 : index
    %c0_6 = arith.constant 0 : index
    %c0_7 = arith.constant 0 : index
    %3 = vector.load %arg2[%c0_5, %c0_6, %c0_7] : memref<1x4x256xf32, #tpu.memory_space<vmem>>, vector<1x4x256xf32>
    %4 = vector.shape_cast %3 : vector<1x4x256xf32> to vector<4x256xf32>
    %cst = arith.constant dense<0.000000e+00> : vector<4x256xf32>
    %5 = tpu.matmul %0, %4, %cst {dimension_numbers = #tpu.dot_dimension_numbers<[1], [0], [0], [1], [0, 0, 1, 1], [], []>} : vector<4x4xf32>, vector<4x256xf32>, vector<4x256xf32> -> vector<4x256xf32>
    %c0_8 = arith.constant 0 : index
    %c0_9 = arith.constant 0 : index
    %c0_10 = arith.constant 0 : index
    %6 = vector.load %arg3[%c0_8, %c0_9, %c0_10] : memref<1x4x256xf32, #tpu.memory_space<vmem>>, vector<1x4x256xf32>
    %7 = vector.shape_cast %6 : vector<1x4x256xf32> to vector<4x256xf32>
    %cst_11 = arith.constant dense<0.000000e+00> : vector<4x256xf32>
    %8 = tpu.matmul %1, %7, %cst_11 {dimension_numbers = #tpu.dot_dimension_numbers<[1], [0], [0], [1], [0, 0, 1, 1], [], []>} : vector<4x4xf32>, vector<4x256xf32>, vector<4x256xf32> -> vector<4x256xf32>
    %9 = arith.addf %5, %8 : vector<4x256xf32>
    %10 = vector.broadcast %2 : vector<4x1xf32> to vector<4x256xf32>
    %11 = arith.addf %9, %10 : vector<4x256xf32>
    %c0_12 = arith.constant 0 : index
    %c0_13 = arith.constant 0 : index
    %c0_14 = arith.constant 0 : index
    %12 = vector.load %arg7[%c0_12, %c0_13, %c0_14] : memref<1x4x256xf32, #tpu.memory_space<vmem>>, vector<1x4x256xf32>
    %13 = vector.shape_cast %12 : vector<1x4x256xf32> to vector<4x256xf32>
    %14 = vector.shape_cast %11 : vector<4x256xf32> to vector<1x4x256xf32>
    tpu.vector_store %arg7[%c0_12, %c0_13, %c0_14], %14 {strides = array<i32>} : memref<1x4x256xf32, #tpu.memory_space<vmem>>, vector<1x4x256xf32>,
    return
  }
  func.func @transform_0(%arg0: i32, %arg1: i32) -> (i32, i32, i32) {
    %c0_i32 = arith.constant 0 : i32
    %c0_i32_0 = arith.constant 0 : i32
    return %arg0, %c0_i32, %arg1 : i32, i32, i32
  }
  func.func @transform_1(%arg0: i32, %arg1: i32) -> (i32, i32, i32) {
    %c0_i32 = arith.constant 0 : i32
    %c0_i32_0 = arith.constant 0 : i32
    return %arg0, %c0_i32, %arg1 : i32, i32, i32
  }
  func.func @transform_2(%arg0: i32, %arg1: i32) -> (i32, i32) {
    %c0_i32 = arith.constant 0 : i32
    %c0_i32_0 = arith.constant 0 : i32
    %c0_i32_1 = arith.constant 0 : i32
    return %c0_i32, %c0_i32_0 : i32, i32
  }
  func.func @transform_3(%arg0: i32, %arg1: i32) -> (i32, i32) {
    %c0_i32 = arith.constant 0 : i32
    %c0_i32_0 = arith.constant 0 : i32
    %c0_i32_1 = arith.constant 0 : i32
    return %c0_i32, %c0_i32_0 : i32, i32
  }
  func.func @transform_4(%arg0: i32, %arg1: i32) -> (i32, i32) {
    %c0_i32 = arith.constant 0 : i32
    %c0_i32_0 = arith.constant 0 : i32
    %c0_i32_1 = arith.constant 0 : i32
    return %c0_i32, %c0_i32_0 : i32, i32
  }
  func.func @transform_5(%arg0: i32, %arg1: i32) -> (i32, i32, i32) {
    %c0_i32 = arith.constant 0 : i32
    %c0_i32_0 = arith.constant 0 : i32
    return %arg0, %c0_i32, %arg1 : i32, i32, i32
  }
}

</mosaic_0001>

<bundles_post_ra>
// kernel: tpu_custom_call.1
= control target key start
LH: loop header
LB: loop body
LE: loop exit
PB: predicated region body
PF: predicated region fallthrough
CT: control target
= control target key end

     0   :  { %s1078_s0 = inlined_call_operand.hbm [shape: f32[2,4,256], index: 0, kind: input, shape index: {}]   ;;  %s1079_s1 = inlined_call_operand.hbm [shape: f32[2,4,256], index: 1, kind: input, shape index: {}]   ;;  %s1080_s2 = inlined_call_operand.vmem [shape: f32[4,4], index: 2, kind: input, shape index: {}]   ;;  %s1081_s3 = inlined_call_operand.hbm [shape: f32[4,4], index: 3, kind: input, shape index: {}]   ;;  %s1082_s4 = inlined_call_operand.vmem [shape: f32[4,1], index: 4, kind: input, shape index: {}]   ;;  %s1083_s5 = inlined_call_operand.hbm [shape: f32[2,4,256], index: 5, kind: output, shape index: {}]  }
   0x1   :  { %1088 = sst [smem:[#allocation18_spill]] %s1081_s3 }
   0x2   :  { %10 = vsyncpa [#allocation3], 0 }
   0x3   :  { %12 = vsyncpa [#allocation3 + $0x1], 0 }
   0x4   :  { %13 = vsyncpa [#allocation6], 0 }
   0x5   :  { %15 = vsyncpa [#allocation6 + $0x1], 0 }
   0x6   :  { %16 = vsyncpa [#allocation4], 0 }
   0x7   :  { %18 = vsyncpa [#allocation4 + $0x1], 0  ;;  %s908_s18 = smov 0   ;;  %s910_s19 = smov 0  }
   0x8   :  { %s912_s20 = smov 0   ;;  %s914_s21 = smov 0  }
   0x9   :  { %s916_s22 = smov 0   ;;  %s918_s23 = smov 0  }
   0xa LB: > { %1089 = sst [smem:[#allocation13_spill]] %s854_s18  ;;  %s939_s24 = sadd.s32 4294967295, %s874_s23   ;;  %s874_s23 = sphi %s918_s23, %s24_s23   ;;  %s870_s22 = sphi %s916_s22, %s1104_s22   ;;  %s866_s21 = sphi %s914_s21, %s1103_s21   ;;  %s862_s20 = sphi %s912_s20, %s1107_s20   ;;  %s858_s19 = sphi %s910_s19, %s1106_s19   ;;  %s854_s18 = sphi %s908_s18, %s1105_s18  }
   0xb   : > { %1090 = sst [smem:[#allocation14_spill]] %s870_s22  ;;  %s583_s25 = sadd.s32 4294967294, %s874_s23  }
   0xc   : > { %p58_p0 = scmp.ne.s32.totalorder %s858_s19, %s854_s18  ;;  %p59_p1 = scmp.eq.s32.totalorder %s939_s24, 0 }
   0xd   : > { %p175_p2 = scmp.eq.s32.totalorder %s939_s24, 1  ;;  %p181_p3 = scmp.eq.s32.totalorder %s583_s25, 1 }
   0xe   : > { %p948_p4 = por %p59_p1, %p58_p0  ;;  %p584_p5 = scmp.ge.s32.totalorder %s874_s23, 1 }
   0xf   : > { %p953_p6 = por %p181_p3, %p58_p0  ;;  %p188_p7 = scmp.lt.s32.totalorder %s874_s23, 3 }
  0x10   : > { %s1094_s3 = sld [smem:[#allocation18_spill]]  ;;  %p586_p9 = scmp.ge.s32.totalorder %s874_s23, 2 }
  0x11   : > { %s1092_s27 = scalar_select %p953_p6, 1, 0 }
  0x12   : > { %p961_p8 = pnand %p584_p5, %p188_p7  ;;  %s876_s7 = smov [#allocation7]  }
  0x13   : > { %1093 = sst [smem:[#allocation15_spill]] %s1092_s27  ;;  %s205_s8 = sshll.u32 %s876_s7, 4  ;;  %s206_s8 = int_to_ptr.vmem [resolvable:$true] %s205_s8 }
  0x14   : > { %p624_p10 = pneg %p961_p8  ;;  %s36_s9 = sadd.s32 1, %s870_s22 }
  0x15   : > { %p38_p12 = scmp.ge.s32.totalorder %s36_s9, 2  ;;  %s45_s10 = sadd.s32 1, %s862_s20 }
  0x16   : > { %s203_s30 = sshll.u32 %s1094_s3, 4  ;;  %p625_p11 = pnand %p624_p10, %p59_p1  ;;  %s204_s30 = int_to_ptr.hbm [resolvable:$true] %s203_s30 }
  0x17   : > { %p52_p13 = scmp.ne.s32.totalorder %s862_s20, %s858_s19  ;;  %p53_p0 = scmp.eq.s32.totalorder %s874_s23, 0 }
  0x18   : > { %627 = dma.hbm_to_vmem [thread:$0]  (!%p625_p11), %s204_s30, 64, %s206_s8, [#allocation6]  }
  0x19   : > { %s1109_s9 = smov (%p38_p12, %s36_s9), 0  ;;  %p977_p3 = por %p53_p0, %p52_p13 }
  0x1a   : > { %1096 = sst [smem:[#allocation16_spill]] %s1109_s9  ;;  %p983_p5 = por %p175_p2, %p52_p13 }
  0x1b   : > { %s40_s13 = ssub.s32 %s870_s22, %s1109_s9  ;;  %p640_p7 = scmp.lt.s32.totalorder %s874_s23, 2 }
  0x1c   : > { %p43_p10 = scmp.eq.s32.totalorder %s40_s13, 0  ;;  %s219_s14 = sand.u32 1, %s862_s20  }
  0x1d   : > { %s587_s15 = sshll.u32 %s219_s14, 3  ;;  %s611_s17 = sshll.u32 %s870_s22, 3 }
  0x1e   : > { %s992_s16 = scalar_select %p43_p10, %s862_s20, %s45_s10  }
  0x1f   : > { %s230_s29 = scalar_lea.hbm %s1078_s0, %s611_s17  ;;  %s223_s30 = scalar_lea.vmem [#allocation2], %s587_s15 }
  0x20   : > { %1099 = sst [smem:[#allocation17_spill]] %s992_s16  ;;  %s234_s7 = sshll.u32 %s223_s30, 4  ;;  %s235_s7 = int_to_ptr.vmem [resolvable:$true] %s234_s7 }
  0x21   : > { %s232_s8 = sshll.u32 %s230_s29, 4  ;;  %p629_p2 = pnand %p640_p7, %p977_p3  ;;  %s233_s8 = int_to_ptr.hbm [resolvable:$true] %s232_s8 }
  0x22   : > { %s252_s13 = scalar_lea.hbm %s1079_s1, %s611_s17  ;;  %s241_s27 = sand.u32 1, %s874_s23  }
  0x23   : > { %s220_s18 = scalar_lea.sflag [#allocation3], %s219_s14  ;;  %s254_s10 = sshll.u32 %s252_s13, 4  ;;  %s255_s10 = int_to_ptr.hbm [resolvable:$true] %s254_s10 }
  0x24   : > { %631 = dma.hbm_to_vmem [thread:$0]  (!%p629_p2), %s233_s8, 128, %s235_s7, %s220_s18  }
  0x25   : > { %s245_s22 = scalar_lea.vmem [#allocation5], %s587_s15  ;;  %s242_s25 = scalar_lea.sflag [#allocation6], %s241_s27 }
  0x26   : > { %s256_s16 = sshll.u32 %s245_s22, 4  ;;  %265 = sbr.rel (%p961_p8) target bundleno = 209 (0xd1), region = 40  ;;  %s257_s16 = int_to_ptr.vmem [resolvable:$true] %s256_s16 }
  0x27   : > { %634 = dma.hbm_to_vmem [thread:$0]  (!%p629_p2), %s255_s10, 128, %s257_s16, %s242_s25  }
  0x28   : > { %s1007_s11 = sand.u32 (!%p961_p8), 1, %s858_s19  }
  0x29   : > { %s1010_s3 = sshll.u32 (!%p961_p8), %s1007_s11, 3  ;;  %s268_s18 = scalar_lea.sflag (!%p961_p8), [#allocation3], %s1007_s11 }
  0x2a   : > { %s271_s9 = scalar_lea.vmem (!%p961_p8), [#allocation2], %s1010_s3 }
  0x2b   : > { %837 = dma.done.wait (%p948_p4), %s268_s18, 128  }
  0x2c   : > { %839 = vsyncadd (%p948_p4), %s268_s18, 4294967168  ;;  %s277_s22 = sand.u32 1, %s939_s24   ;;  %s281_s6 = scalar_lea.vmem [#allocation5], %s1010_s3 }
  0x2d   : > { %s278_s27 = scalar_lea.sflag [#allocation6], %s277_s22 }
  0x2e   : > { %841 = dma.done.wait (%p948_p4), %s278_s27, 128  }
  0x2f   : > { %843 = vsyncadd (%p948_p4), %s278_s27, 4294967168 }
  0x30   : > { %845 = dma.done.wait (%p59_p1), [#allocation6], 64  }
  0x31   : > { %847 = vsyncadd (%p59_p1), [#allocation6], 4294967232  ;;  %v877_v0 = vmov 0   ;;  %v326_v1 = vld [vmem:[%s281_s6] sm:$0xff]  ;;  %v325_v3 = vld [vmem:[%s271_s9] sm:$0xff]  ;;  %vm335_vm0 = vcmask 1043456  }
  0x32   : > { %693 = vset.pattern.permute.xlu0 %v877_v0  ;;  %328 = vst [vmem:[#allocation1] ss:$2 sm:$0xff] %v326_v1  ;;  %v324_v2 = vld [vmem:[%s1082_s4] sm:$0xf]  ;;  %v323_v4 = vld [vmem:[#allocation7] sm:$0xf] }
  0x33   : > { %433 = vperm.xlu0 %693, %v324_v2   ;;  %vm331_vm1 = vcmask 31744   ;;  %v322_v7 = vld [vmem:[%s1080_s2] sm:$0xf]  ;;  %s613_s16 = sshll.u32 %s866_s21, 3  ;;  %s318_s30 = scalar_lea.vmem [#allocation8], %s1010_s3 }
  0x34   : > { %s458_s29 = scalar_lea.hbm %s1083_s5, %s613_s16  ;;  %s460_s7 = sshll.u32 %s318_s30, 4  ;;  %s461_s7 = int_to_ptr.vmem [resolvable:$true] %s460_s7 }
  0x35   : > { %s462_s8 = sshll.u32 %s458_s29, 4  ;;  %s445_s21 = scalar_lea.sflag [#allocation4], %s1007_s11  ;;  %s463_s8 = int_to_ptr.hbm [resolvable:$true] %s462_s8 }
  0x36   : > { %s798_s13 = sshra.s32 %s463_s8, 4  ;;  %s804_s3 = scalar_lea.hbm %s1083_s5, 16  ;;  %s799_s13 = int_to_ptr.hbm [resolvable:$true] %s798_s13 }
  0x37   : > { %s800_s10 = scalar_lea.hbm %s799_s13, 8  ;;  %p805_p11 = scmp.lt.s32.totalorder %s799_s13, %s1083_s5 }
  0x38   : > { %p801_p1 = scmp.ne.s32.totalorder %s799_s13, %s800_s10  ;;  %p806_p12 = scmp.lt.s32.totalorder %s804_s3, %s800_s10 }
  0x39   : > { %v329_v5 = vld.sshfl [vmem:[#allocation1] sm:$0xff pattern:$0x75316420]  ;;  %v330_v6 = vld.sshfl [vmem:[#allocation1 + $0x8] sm:$0xff pattern:$0x75316420] }
  0x3a   : > { %381 = vst [vmem:[#allocation1] ss:$2 sm:$0xff] %v325_v3  ;;  %598 = vmatpush.msk.msra.mxu0 %vm335_vm0, %v329_v5  ;;  %600 = vmatpush.msk.msra.mxu1 %vm335_vm0, %v330_v6  ;;  %p802_p4 = pnand %p801_p1, %p983_p5  ;;  %p807_p13 = por %p806_p12, %p805_p11 }
  0x3b   : > { %599 = vmatmul.msk.f32.vlgmr.msra.gmra.mxu0 %vm331_vm1, %v323_v4  ;;  %601 = vmatmul.msk.f32.vlgmr.msra.gmra.mxu1 %vm331_vm1, %v323_v4 }
  0x3c   : > { %p803_p8 = pneg %p802_p4 }
  0x3e   : > { %p808_p0 = pnand %p807_p13, %p803_p8 }
  0x41   : > { %v382_v8 = vld.sshfl [vmem:[#allocation1] sm:$0xff pattern:$0x75316420]  ;;  %v383_v9 = vld.sshfl [vmem:[#allocation1 + $0x8] sm:$0xff pattern:$0x75316420] }
  0x42   : > { %602 = vmatpush.msk.msra.mxu2 %vm335_vm0, %v382_v8  ;;  %604 = vmatpush.msk.msra.mxu3 %vm335_vm0, %v383_v9 }
  0x43   : > { %603 = vmatmul.msk.f32.vlgmr.msra.gmra.mxu2 %vm331_vm1, %v322_v7  ;;  %605 = vmatmul.msk.f32.vlgmr.msra.gmra.mxu3 %vm331_vm1, %v322_v7 }
  0xa5   : > { %v434_v12 = vpop.permute.xlu0 %433 }
  0xb8   : > { %v357_v10 = vpop.f32.mrf.mxu0  ;;  %v377_v11 = vpop.f32.mrf.mxu1 }
  0xc6   : > { %v408_v13 = vpop.f32.mrf.mxu2  ;;  %v428_v14 = vpop.f32.mrf.mxu3 }
  0xc7   : > { %v409_v15 = vadd.f32 %v408_v13, %v357_v10  ;;  %v429_v16 = vadd.f32 %v428_v14, %v377_v11 }
  0xc9   : > { %v437_v17 = vadd.f32 %v434_v12, %v429_v16  ;;  %v436_v18 = vadd.f32 %v434_v12, %v409_v15 }
  0xcb   : > { %v440_v19 = vrot.slane %v437_v17, 4 }
  0xcd   : > { %v441_v20 = vsel %vm335_vm0, %v436_v18, %v440_v19 }
  0xce   : > { %443 = vst [vmem:[%s318_s30] sm:$0xff] %v441_v20 }
  0xcf   : > { %811 = shalt.err (!%p808_p0)
}
  0xd0   : > { %622 = dma.vmem_to_hbm [thread:$0]  (%p983_p5), %s461_s7, 128, %s463_s8, %s445_s21  }
  0xd1 PF: > { %s1100_s11 = sld [smem:[#allocation13_spill]]  ;;  %p636_p3 = pnand %p586_p9, %p953_p6 }
  0xd3   : > { %p637_p7 = pneg %p636_p3 }
  0xd7   : > { %s474_s6 = sand.u32 1, %s1100_s11  }
  0xd8   : > { %s475_s14 = scalar_lea.sflag [#allocation4], %s474_s6 }
  0xd9   : > { %849 = dma.done.wait (%p637_p7), %s475_s14, 128  }
  0xda   : > { %851 = vsyncadd (%p637_p7), %s475_s14, 4294967168  ;;  %s24_s23 = sadd.s32 1, %s874_s23   ;;  %s1102_s15 = sld [smem:[#allocation17_spill]] }
  0xdb   : > { %p21_p10 = scmp.ge.s32.totalorder %s24_s23, 4   ;;  %s1103_s21 = sld [smem:[#allocation14_spill]] }
  0xdc   : > { %s1104_s22 = sld [smem:[#allocation16_spill]]  ;;  %s1105_s18 = smov %s858_s19 }
  0xdd   : > { %s1106_s19 = smov %s862_s20  ;;  %23 = sbr.rel (!%p21_p10) target bundleno = 10 (0xa), region = 102 }
  0xe0   : > { %s1107_s20 = smov %s1102_s15 }
  0xe2   :  { %481 = vsyncpa [#allocation3], 1 }
  0xe3   :  { %483 = vsyncpa [#allocation3 + $0x1], 1 }
  0xe4   :  { %484 = vsyncpa [#allocation6], 1 }
  0xe5   :  { %486 = vsyncpa [#allocation6 + $0x1], 1 }
  0xe6   :  { %487 = vsyncpa [#allocation4], 1 }
  0xe7   :  { %489 = vsyncpa [#allocation4 + $0x1], 1 }

</bundles_post_ra>
